<compile_context>
chip_gen: v7x
topology: tpu7x:2x2x1
jax: 0.10.0
libtpu: 0.0.40
codegen_flags: <defaults>
</compile_context>

<pallas_src>
import functools

import jax
import jax.numpy as jnp
from jax.experimental import pallas as pl

BN_EPS = 1e-5


def _fused_deconv_bn_relu_kernel(p_ref, w_ref, g_ref, b_ref, o_ref, *,
                                 n_phases, cout, count):
    """ConvTranspose2d (all S*S phases via one block-diagonal MXU matmul)
    + BatchNorm2d (training-mode batch stats, biased var) + ReLU, fully fused.

    p_ref: (G*Csub, Npix)   bf16  phase-stacked im2col patches (taps x Cin on
                                  sublanes, all output pixels of each phase on
                                  the 128-lane axis)
    w_ref: (G*Cout, G*Csub) bf16  block-diagonal phase sub-kernels
    g_ref: (1, Cout, 1)     f32   BN weight (gamma)
    b_ref: (1, Cout, 1)     f32   BN bias (beta)
    o_ref: (G, Cout, Npix)  f32   BN+ReLU'd conv output, phase-major
    """
    # One MXU matmul for every phase at once; f32 accumulation.
    y = jnp.dot(w_ref[...], p_ref[...],
                preferred_element_type=jnp.float32)          # (G*Cout, Npix)
    y3 = y.reshape(n_phases, cout, y.shape[-1])              # (G, Cout, Npix)

    # Per-channel batch statistics over (phases, pixels) while the conv result
    # is still live in VMEM (no HBM round trip for the intermediate).
    inv_n = 1.0 / count
    s1 = jnp.sum(jnp.sum(y3, axis=2, keepdims=True), axis=0, keepdims=True)
    s2 = jnp.sum(jnp.sum(y3 * y3, axis=2, keepdims=True), axis=0, keepdims=True)
    mean = s1 * inv_n                                        # (1, Cout, 1)
    var = jnp.maximum(s2 * inv_n - mean * mean, 0.0)         # clamp: cancellation guard

    scale = g_ref[...] * jax.lax.rsqrt(var + BN_EPS)         # (1, Cout, 1)
    bias = b_ref[...] - mean * scale
    o_ref[...] = jnp.maximum(y3 * scale + bias, 0.0)
    # TODO(synk): nn.BatchNorm2d's running_mean/running_var in-place updates
    # (training-time side effect) are not reproduced; the output is unaffected.


@functools.partial(jax.jit, static_argnames=("stride", "padding", "compute_dtype"))
def deconv_block(x_nchw, w_t, gamma, beta, *, stride, padding,
                 compute_dtype=jnp.bfloat16):
    """ConvTranspose2d(bias=False) -> BatchNorm2d (train stats) -> ReLU.

    x_nchw: (N, Cin, H, W)      activations, PyTorch NCHW
    w_t:    (Cin, Cout, K, K)   nn.ConvTranspose2d weight layout
    gamma, beta: (Cout,)        nn.BatchNorm2d affine parameters
    """
    N, Cin, H, W = x_nchw.shape
    Cin_w, Cout, K, _ = w_t.shape
    assert Cin == Cin_w
    S, P = int(stride), int(padding)
    Ho = (H - 1) * S - 2 * P + K
    Wo = (W - 1) * S - 2 * P + K
    # Sub-pixel (phase) decomposition requirements (hold for the usual
    # upsampling configs, e.g. kernel=4, stride=2, padding=1).
    assert K % S == 0, "phase decomposition needs stride | kernel"
    assert Ho % S == 0 and Wo % S == 0

    T = K // S                  # sub-kernel extent per phase
    Hq, Wq = Ho // S, Wo // S   # per-phase output spatial extent
    G = S * S                   # number of output phases
    Csub = T * T * Cin          # per-phase contraction depth (taps x Cin)
    Npix = N * Hq * Wq          # lane axis: every output pixel of one phase

    # Per-phase tap geometry: output row (S*oq + r) pulls input rows
    # (oq - t + e[r]) through kernel taps kh = S*t + m[r].
    m = [(r + P) % S for r in range(S)]
    e = [(r + P - m[r]) // S for r in range(S)]
    pad_lo = max(0, (T - 1) - min(e))
    pad_hi_h = max(0, (max(e) + Hq - 1) - (H - 1))
    pad_hi_w = max(0, (max(e) + Wq - 1) - (W - 1))

    # Glue in the compute dtype (bf16): pad/slice/stack are exact, so casting
    # BEFORE the im2col halves its HBM traffic with no numerics change.
    x = x_nchw.astype(compute_dtype)
    xpad = jnp.pad(x, ((0, 0), (0, 0), (pad_lo, pad_hi_h), (pad_lo, pad_hi_w)))

    # Per-phase im2col (T*T taps x Cin) and sub-kernel extraction — pure layout
    # plumbing so the whole deconv becomes a single lane-dense matmul.
    patch_blocks, wsub_blocks = [], []
    for rh in range(S):
        for rw in range(S):
            taps = []
            for th in range(T):
                hs = e[rh] - th + pad_lo
                for tw in range(T):
                    ws = e[rw] - tw + pad_lo
                    taps.append(xpad[:, :, hs:hs + Hq, ws:ws + Wq])  # (N,Cin,Hq,Wq)
            tap = jnp.stack(taps, axis=0)               # (T*T, N, Cin, Hq, Wq)
            tap = jnp.transpose(tap, (0, 2, 1, 3, 4))   # (T*T, Cin, N, Hq, Wq)
            patch_blocks.append(tap.reshape(Csub, Npix))
            # Sub-kernel taps for this phase: kh = S*th + m[rh], kw = S*tw + m[rw]
            wsel = w_t[:, :, m[rh]::S, m[rw]::S]                      # (Cin,Cout,T,T)
            wsub_blocks.append(
                jnp.transpose(wsel, (1, 2, 3, 0)).reshape(Cout, Csub))
    patches = jnp.concatenate(patch_blocks, axis=0)     # (G*Csub, Npix) bf16

    # Block-diagonal weight: the whole transposed conv is ONE
    # (G*Cout, G*Csub) @ (G*Csub, Npix) MXU matmul.
    wbd = jnp.zeros((G, Cout, G, Csub), w_t.dtype)
    for g in range(G):
        wbd = wbd.at[g, :, g, :].set(wsub_blocks[g])
    wbd = wbd.reshape(G * Cout, G * Csub).astype(compute_dtype)

    gamma3 = gamma.reshape(1, Cout, 1).astype(jnp.float32)
    beta3 = beta.reshape(1, Cout, 1).astype(jnp.float32)

    out_phases = pl.pallas_call(
        functools.partial(_fused_deconv_bn_relu_kernel,
                          n_phases=G, cout=Cout, count=float(N * Ho * Wo)),
        out_shape=jax.ShapeDtypeStruct((G, Cout, Npix), jnp.float32),
        # Gridless: every operand is a single whole-array VMEM block.
        in_specs=[
            pl.BlockSpec((G * Csub, Npix), lambda *_: (0, 0)),
            pl.BlockSpec((G * Cout, G * Csub), lambda *_: (0, 0)),
            pl.BlockSpec((1, Cout, 1), lambda *_: (0, 0, 0)),
            pl.BlockSpec((1, Cout, 1), lambda *_: (0, 0, 0)),
        ],
        out_specs=pl.BlockSpec((G, Cout, Npix), lambda *_: (0, 0, 0)),
    )(patches, wbd, gamma3, beta3)

    # Glue: depth-to-space interleave of the S*S phases back to PyTorch NCHW.
    # TODO(synk): this is one extra pass over the output tensor; skip it if the
    # downstream consumer can take the phase-major (G, Cout, Npix) layout.
    y = out_phases.reshape(S, S, Cout, N, Hq, Wq)   # (rh, rw, co, n, oq, owq)
    y = jnp.transpose(y, (3, 2, 4, 0, 5, 1))        # (n, co, oq, rh, owq, rw)
    return y.reshape(N, Cout, Ho, Wo)


def reference(x_nchw, w_t, gamma, beta, *, stride, padding,
              compute_dtype=jnp.bfloat16):
    """Pure-JAX/XLA reference.  Conv inputs are cast to the same compute dtype
    as the kernel (bf16 in, f32 accumulate) so the comparison isolates kernel
    correctness from the dtype choice."""
    K = w_t.shape[2]
    x = jnp.transpose(x_nchw, (0, 2, 3, 1)).astype(compute_dtype)
    wf = jnp.transpose(jnp.flip(w_t, axis=(2, 3)), (2, 3, 0, 1)).astype(compute_dtype)
    pad = K - 1 - padding
    y = jax.lax.conv_general_dilated(
        x, wf, window_strides=(1, 1),
        padding=[(pad, pad), (pad, pad)],
        lhs_dilation=(stride, stride),
        dimension_numbers=("NHWC", "HWIO", "NHWC"),
        preferred_element_type=jnp.float32)
    mean = jnp.mean(y, axis=(0, 1, 2), keepdims=True)
    var = jnp.mean((y - mean) ** 2, axis=(0, 1, 2), keepdims=True)
    yh = (y - mean) * jax.lax.rsqrt(var + BN_EPS)
    out = jnp.maximum(yh * gamma.reshape(1, 1, 1, -1) + beta.reshape(1, 1, 1, -1), 0.0)
    return jnp.transpose(out, (0, 3, 1, 2))


if __name__ == "__main__":
    # DeconvBlock(inplanes=4, outplanes=8, kernel=4, stride=2, padding=1)
    N, Cin, Cout, H, W = 2, 4, 8, 16, 16
    K, S, P = 4, 2, 1

    key = jax.random.PRNGKey(0)
    kx, kw, kg, kb = jax.random.split(key, 4)
    x = jax.random.normal(kx, (N, Cin, H, W), jnp.float32)
    # nn.ConvTranspose2d weight layout: (in_channels, out_channels, kH, kW), bias=False
    w_t = 0.1 * jax.random.normal(kw, (Cin, Cout, K, K), jnp.float32)
    # BN affine params (module defaults are ones/zeros; non-trivial values here
    # to exercise the fused scale/bias path)
    gamma = 1.0 + 0.1 * jax.random.normal(kg, (Cout,), jnp.float32)
    beta = 0.1 * jax.random.normal(kb, (Cout,), jnp.float32)

    out = jax.block_until_ready(deconv_block(x, w_t, gamma, beta, stride=S, padding=P))
    ref = jax.block_until_ready(reference(x, w_t, gamma, beta, stride=S, padding=P))

    Ho = (H - 1) * S - 2 * P + K
    assert out.shape == (N, Cout, Ho, Ho), out.shape
    assert bool(jnp.all(jnp.isfinite(out)))
    err = float(jnp.max(jnp.abs(out - ref)))
    assert err < 1e-3, err
    print("KERNEL_OK")
</pallas_src>

<mosaic_0001>
module attributes {stable_mosaic.version = 11 : i64} {
  func.func @_fused_deconv_bn_relu_kernel(%arg0: memref<64x512xbf16, #tpu.memory_space<vmem>>, %arg1: memref<32x64xbf16, #tpu.memory_space<vmem>>, %arg2: memref<1x8x1xf32, #tpu.memory_space<vmem>>, %arg3: memref<1x8x1xf32, #tpu.memory_space<vmem>>, %arg4: memref<4x8x512xf32, #tpu.memory_space<vmem>>) attributes {dimension_semantics = [], scalar_prefetch = 0 : i64, scratch_operands = 0 : i64, tpu.core_type = #tpu.core_type<tc>} {
    %c0 = arith.constant 0 : index
    %c0_0 = arith.constant 0 : index
    %0 = vector.load %arg1[%c0, %c0_0] : memref<32x64xbf16, #tpu.memory_space<vmem>>, vector<32x64xbf16>
    %c0_1 = arith.constant 0 : index
    %c0_2 = arith.constant 0 : index
    %1 = vector.load %arg0[%c0_1, %c0_2] : memref<64x512xbf16, #tpu.memory_space<vmem>>, vector<64x512xbf16>
    %cst = arith.constant dense<0.000000e+00> : vector<32x512xf32>
    %2 = tpu.matmul %0, %1, %cst {dimension_numbers = #tpu.dot_dimension_numbers<[1], [0], [0], [1], [0, 0, 1, 1], [], []>} : vector<32x64xbf16>, vector<64x512xbf16>, vector<32x512xf32> -> vector<32x512xf32>
    %3 = vector.shape_cast %2 : vector<32x512xf32> to vector<4x8x512xf32>
    %cst_3 = arith.constant dense<0.000000e+00> : vector<4x8xf32>
    %4 = vector.multi_reduction <add>, %3, %cst_3 [2] : vector<4x8x512xf32> to vector<4x8xf32>
    %5 = vector.shape_cast %4 : vector<4x8xf32> to vector<4x8x1xf32>
    %cst_4 = arith.constant dense<0.000000e+00> : vector<8x1xf32>
    %6 = vector.multi_reduction <add>, %5, %cst_4 [0] : vector<4x8x1xf32> to vector<8x1xf32>
    %7 = vector.shape_cast %6 : vector<8x1xf32> to vector<1x8x1xf32>
    %8 = arith.mulf %3, %3 : vector<4x8x512xf32>
    %cst_5 = arith.constant dense<0.000000e+00> : vector<4x8xf32>
    %9 = vector.multi_reduction <add>, %8, %cst_5 [2] : vector<4x8x512xf32> to vector<4x8xf32>
    %10 = vector.shape_cast %9 : vector<4x8xf32> to vector<4x8x1xf32>
    %cst_6 = arith.constant dense<0.000000e+00> : vector<8x1xf32>
    %11 = vector.multi_reduction <add>, %10, %cst_6 [0] : vector<4x8x1xf32> to vector<8x1xf32>
    %12 = vector.shape_cast %11 : vector<8x1xf32> to vector<1x8x1xf32>
    %cst_7 = arith.constant 4.8828125E-4 : f32
    %13 = vector.broadcast %cst_7 : f32 to vector<1x8x1xf32>
    %14 = arith.mulf %7, %13 : vector<1x8x1xf32>
    %cst_8 = arith.constant 4.8828125E-4 : f32
    %15 = vector.broadcast %cst_8 : f32 to vector<1x8x1xf32>
    %16 = arith.mulf %12, %15 : vector<1x8x1xf32>
    %17 = arith.mulf %14, %14 : vector<1x8x1xf32>
    %18 = arith.subf %16, %17 : vector<1x8x1xf32>
    %cst_9 = arith.constant 0.000000e+00 : f32
    %19 = vector.broadcast %cst_9 : f32 to vector<1x8x1xf32>
    %20 = arith.maximumf %18, %19 : vector<1x8x1xf32>
    %c0_10 = arith.constant 0 : index
    %c0_11 = arith.constant 0 : index
    %c0_12 = arith.constant 0 : index
    %21 = vector.load %arg2[%c0_10, %c0_11, %c0_12] : memref<1x8x1xf32, #tpu.memory_space<vmem>>, vector<1x8x1xf32>
    %cst_13 = arith.constant 9.99999974E-6 : f32
    %22 = vector.broadcast %cst_13 : f32 to vector<1x8x1xf32>
    %23 = arith.addf %20, %22 : vector<1x8x1xf32>
    %24 = math.rsqrt %23 : vector<1x8x1xf32>
    %25 = arith.mulf %21, %24 : vector<1x8x1xf32>
    %c0_14 = arith.constant 0 : index
    %c0_15 = arith.constant 0 : index
    %c0_16 = arith.constant 0 : index
    %26 = vector.load %arg3[%c0_14, %c0_15, %c0_16] : memref<1x8x1xf32, #tpu.memory_space<vmem>>, vector<1x8x1xf32>
    %27 = arith.mulf %14, %25 : vector<1x8x1xf32>
    %28 = arith.subf %26, %27 : vector<1x8x1xf32>
    %29 = vector.broadcast %25 : vector<1x8x1xf32> to vector<4x8x512xf32>
    %30 = arith.mulf %3, %29 : vector<4x8x512xf32>
    %31 = vector.broadcast %28 : vector<1x8x1xf32> to vector<4x8x512xf32>
    %32 = arith.addf %30, %31 : vector<4x8x512xf32>
    %cst_17 = arith.constant 0.000000e+00 : f32
    %33 = vector.broadcast %cst_17 : f32 to vector<4x8x512xf32>
    %34 = arith.maximumf %32, %33 : vector<4x8x512xf32>
    %c0_18 = arith.constant 0 : index
    %c0_19 = arith.constant 0 : index
    %c0_20 = arith.constant 0 : index
    %35 = vector.load %arg4[%c0_18, %c0_19, %c0_20] : memref<4x8x512xf32, #tpu.memory_space<vmem>>, vector<4x8x512xf32>
    tpu.vector_store %arg4[%c0_18, %c0_19, %c0_20], %34 {strides = array<i32>} : memref<4x8x512xf32, #tpu.memory_space<vmem>>, vector<4x8x512xf32>,
    return
  }
}

</mosaic_0001>

<bundles_post_ra>
// kernel: deconv_block.1
= control target key start
LH: loop header
LB: loop body
LE: loop exit
PB: predicated region body
PF: predicated region fallthrough
CT: control target
= control target key end

     0   :  { %v446_v1 = vmov 0   ;;  %vm128_vm0 = vcmask 523264   ;;  %s676_s0 = inlined_call_operand.vmem [shape: bf16[64,512], index: 0, kind: input, shape index: {}]   ;;  %s677_s1 = inlined_call_operand.vmem [shape: bf16[32,64], index: 1, kind: input, shape index: {}]   ;;  %s678_s2 = inlined_call_operand.vmem [shape: f32[1,8,1], index: 2, kind: input, shape index: {}]   ;;  %s679_s3 = inlined_call_operand.vmem [shape: f32[1,8,1], index: 3, kind: input, shape index: {}]   ;;  %s680_s4 = inlined_call_operand.vmem [shape: f32[4,8,512], index: 4, kind: output, shape index: {}]  }
   0x1   :  { %v418_v0 = vld [vmem:[%s676_s0 + $0x4] ss:$16 sps:$4 sm:$0xff]   ;;  %167 = vmatprep.mubr.bf16.mxu0 %v446_v1  ;;  %220 = vmatprep.mubr.bf16.mxu1 %v446_v1  ;;  %v420_v2 = vld [vmem:[%s676_s0 + $0xc] ss:$16 sps:$4 sm:$0xff]   ;;  %v422_v3 = vld [vmem:[%s676_s0] ss:$16 sps:$4 sm:$0xff]  }
   0x2   :  { %416 = vset.pattern.permute.xlu0 %v446_v1  ;;  %417 = vset.pattern.permute.xlu1 %v446_v1  ;;  %v423_v4 = vld [vmem:[%s676_s0 + $0x8] ss:$16 sps:$4 sm:$0xff]   ;;  %v424_v5 = vld [vmem:[%s676_s0 + $0x24] ss:$16 sps:$4 sm:$0xff]   ;;  %v426_v6 = vld [vmem:[%s676_s0 + $0x2c] ss:$16 sps:$4 sm:$0xff]  }
   0x3   :  { %135 = vmatprep.subr.bf16.mxu0 %v418_v0  ;;  %188 = vmatprep.subr.bf16.mxu1 %v420_v2  ;;  %v428_v7 = vld [vmem:[%s676_s0 + $0x20] ss:$16 sps:$4 sm:$0xff]   ;;  %v429_v8 = vld [vmem:[%s676_s0 + $0x28] ss:$16 sps:$4 sm:$0xff]   ;;  %v430_v9 = vld [vmem:[%s676_s0 + $0x44] ss:$16 sps:$4 sm:$0xff]  }
   0x4   :  { %136 = vmatpush1.bf16.msra.mxu0 %v422_v3  ;;  %189 = vmatpush1.bf16.msra.mxu1 %v423_v4  ;;  %v432_v10 = vld [vmem:[%s676_s0 + $0x4c] ss:$16 sps:$4 sm:$0xff]   ;;  %v434_v11 = vld [vmem:[%s676_s0 + $0x40] ss:$16 sps:$4 sm:$0xff]   ;;  %v435_v12 = vld [vmem:[%s676_s0 + $0x48] ss:$16 sps:$4 sm:$0xff]  }
   0x5   :  { %137 = vmatprep.subr.bf16.mxu0 %v424_v5  ;;  %190 = vmatprep.subr.bf16.mxu1 %v426_v6  ;;  %v436_v13 = vld [vmem:[%s676_s0 + $0x64] ss:$16 sps:$4 sm:$0xff]   ;;  %v438_v14 = vld [vmem:[%s676_s0 + $0x6c] ss:$16 sps:$4 sm:$0xff]   ;;  %v440_v15 = vld [vmem:[%s676_s0 + $0x60] ss:$16 sps:$4 sm:$0xff]  }
   0x6   :  { %v441_v16 = vld [vmem:[%s676_s0 + $0x68] ss:$16 sps:$4 sm:$0xff]   ;;  %v442_v17 = vld [vmem:[%s677_s1] sm:$0xff]  }
   0x7   :  { %v443_v18 = vld [vmem:[%s677_s1 + $0x8] sm:$0xff]  }
   0x8   :  { %138 = vmatpush1.bf16.msra.mxu0 %v428_v7  ;;  %191 = vmatpush1.bf16.msra.mxu1 %v429_v8 }
   0x9   :  { %139 = vmatprep.subr.bf16.mxu0 %v430_v9  ;;  %192 = vmatprep.subr.bf16.mxu1 %v432_v10 }
   0xc   :  { %140 = vmatpush1.bf16.msra.mxu0 %v434_v11  ;;  %193 = vmatpush1.bf16.msra.mxu1 %v435_v12 }
   0xd   :  { %141 = vmatprep.subr.bf16.mxu0 %v436_v13  ;;  %194 = vmatprep.subr.bf16.mxu1 %v438_v14 }
  0x10   :  { %142 = vmatpush1.bf16.msra.mxu0 %v440_v15  ;;  %195 = vmatpush1.bf16.msra.mxu1 %v441_v16 }
  0x13   :  { %411 = vmatmul.mubr.msk.bf16.vlgmr.msra.gmra.mrb[0].mxu0 %vm128_vm0, %v442_v17  ;;  %413 = vmatmul.mubr.msk.bf16.vlgmr.msra.gmra.mrb[0].mxu1 %vm128_vm0, %v442_v17 }
  0x14   :  { %177 = vmatprep.mubr.bf16.mxu0 %v446_v1  ;;  %230 = vmatprep.mubr.bf16.mxu1 %v446_v1 }
  0x1b   :  { %412 = vmatmul.mubr.msk.bf16.gmra.mrb[4].mxu0 %vm128_vm0, %v443_v18  ;;  %414 = vmatmul.mubr.msk.bf16.gmra.mrb[4].mxu1 %vm128_vm0, %v443_v18 }
  0xe6   :  { %v526_v19 = vpop.f32.mrb[0].mxu0  ;;  %v528_v20 = vpop.f32.mrb[0].mxu1 }
  0xe7   :  { %v264_v21 = vmul.f32 %v526_v19, %v526_v19  ;;  %v532_v22 = vpop.f32.mrb[1].mxu0  ;;  %v534_v23 = vpop.f32.mrb[1].mxu1  ;;  %v266_v24 = vmul.f32 %v528_v20, %v528_v20 }
  0xe8   :  { %v241_v25 = vadd.f32 %v532_v22, %v526_v19  ;;  %v265_v26 = vmul.f32 %v532_v22, %v532_v22  ;;  %v542_v27 = vpop.f32.mrb[2].mxu0  ;;  %v544_v28 = vpop.f32.mrb[2].mxu1  ;;  %v267_v37 = vmul.f32 %v534_v23, %v534_v23 }
  0xe9   :  { %v268_v29 = vmul.f32 %v542_v27, %v542_v27  ;;  %v548_v30 = vpop.f32.mrb[3].mxu0  ;;  %v550_v31 = vpop.f32.mrb[3].mxu1  ;;  %v270_v36 = vmul.f32 %v544_v28, %v544_v28 }
  0xea   :  { %v246_v32 = vadd.f32 %v548_v30, %v542_v27  ;;  %v269_v33 = vmul.f32 %v548_v30, %v548_v30  ;;  %v242_v34 = vadd.f32 %v241_v25, %v528_v20  ;;  %v280_v35 = vadd.f32 %v265_v26, %v264_v21 }
  0xeb   :  { %v271_v46 = vmul.f32 %v550_v31, %v550_v31 }
  0xec   :  { %v243_v38 = vadd.f32 %v242_v34, %v534_v23  ;;  %v281_v39 = vadd.f32 %v280_v35, %v266_v24  ;;  %v247_v40 = vadd.f32 %v246_v32, %v544_v28  ;;  %v285_v41 = vadd.f32 %v269_v33, %v268_v29 }
  0xee   :  { %v563_v42 = vpop.f32.mrb[4].mxu1  ;;  %244 = vadd.xlane.f32.xlu0 %v243_v38  ;;  %v565_v43 = vpop.f32.mrb[4].mxu0  ;;  %v282_v44 = vadd.f32 %v281_v39, %v267_v37  ;;  %v248_v45 = vadd.f32 %v247_v40, %v550_v31  ;;  %v286_v47 = vadd.f32 %v285_v41, %v270_v36  ;;  %v308_v39 = vld [vmem:[%s678_s2] sm:$0xff] }
  0xef   :  { %v272_v48 = vmul.f32 %v565_v43, %v565_v43  ;;  %v572_v49 = vpop.f32.mrb[5].mxu0  ;;  %v574_v50 = vpop.f32.mrb[5].mxu1  ;;  %v274_v56 = vmul.f32 %v563_v42, %v563_v42 }
  0xf0   :  { %v251_v51 = vadd.f32 %v572_v49, %v565_v43  ;;  %v273_v52 = vmul.f32 %v572_v49, %v572_v49  ;;  %v580_v53 = vpop.f32.mrb[6].mxu1  ;;  %283 = vadd.xlane.f32.xlu1 %v282_v44  ;;  %v582_v54 = vpop.f32.mrb[6].mxu0  ;;  %v287_v55 = vadd.f32 %v286_v47, %v271_v46  ;;  %v275_v4 = vmul.f32 %v574_v50, %v574_v50  ;;  %v312_v44 = vld [vmem:[%s679_s3] sm:$0xff] }
  0xf1   :  { %v276_v57 = vmul.f32 %v582_v54, %v582_v54  ;;  %v588_v58 = vpop.f32.mrb[7].mxu0  ;;  %v590_v59 = vpop.f32.mrb[7].mxu1  ;;  %v278_v0 = vmul.f32 %v580_v53, %v580_v53 }
  0xf2   :  { %v256_v60 = vadd.f32 %v588_v58, %v582_v54  ;;  %v277_v61 = vmul.f32 %v588_v58, %v588_v58  ;;  %249 = vadd.xlane.f32.xlu0 %v248_v45  ;;  %v252_v62 = vadd.f32 %v251_v51, %v563_v42  ;;  %v290_v63 = vadd.f32 %v273_v52, %v272_v48 }
  0xf3   :  { %v279_v6 = vmul.f32 %v590_v59, %v590_v59 }
  0xf4   :  { %v295_v1 = vadd.f32 %v277_v61, %v276_v57  ;;  %v253_v2 = vadd.f32 %v252_v62, %v574_v50  ;;  %v257_v3 = vadd.f32 %v256_v60, %v580_v53  ;;  %v291_v5 = vadd.f32 %v290_v63, %v274_v56 }
  0xf6   :  { %288 = vadd.xlane.f32.xlu0 %v287_v55  ;;  %254 = vadd.xlane.f32.xlu1 %v253_v2  ;;  %v258_v7 = vadd.f32 %v257_v3, %v590_v59  ;;  %v296_v8 = vadd.f32 %v295_v1, %v278_v0  ;;  %v292_v9 = vadd.f32 %v291_v5, %v275_v4 }
  0xf8   :  { %v297_v10 = vadd.f32 %v296_v8, %v279_v6 }
  0xfa   :  { %293 = vadd.xlane.f32.xlu0 %v292_v9  ;;  %259 = vadd.xlane.f32.xlu1 %v258_v7 }
  0xfe   :  { %298 = vadd.xlane.f32.xlu1 %v297_v10 }
 0x17b   :  { %v245_v11 = vpop.xlane.xlu0 %244 }
 0x17d   :  { %v284_v12 = vpop.xlane.xlu1 %283 }
 0x17f   :  { %v250_v13 = vpop.xlane.xlu0 %249 }
 0x180   :  { %v261_v16 = vadd.f32 %v250_v13, %v245_v11 }
 0x183   :  { %v289_v14 = vpop.xlane.xlu0 %288  ;;  %v255_v15 = vpop.xlane.xlu1 %254 }
 0x184   :  { %v262_v17 = vadd.f32 %v261_v16, %v255_v15  ;;  %v300_v24 = vadd.f32 %v289_v14, %v284_v12 }
 0x187   :  { %v294_v18 = vpop.xlane.xlu0 %293  ;;  %v260_v21 = vpop.xlane.xlu1 %259 }
 0x188   :  { %v263_v25 = vadd.f32 %v262_v17, %v260_v21  ;;  %v301_v26 = vadd.f32 %v300_v24, %v294_v18 }
 0x18a   :  { %v303_v29 = vmul.f32 0.00048828125, %v263_v25 }
 0x18b   :  { %v299_v32 = vpop.xlane.xlu1 %298 }
 0x18c   :  { %v302_v33 = vadd.f32 %v301_v26, %v299_v32  ;;  %v305_v34 = vmul.f32 %v303_v29, %v303_v29 }
 0x18e   :  { %v304_v35 = vmul.f32 0.00048828125, %v302_v33 }
 0x190   :  { %v306_v36 = vsub.f32 %v304_v35, %v305_v34 }
 0x192   :  { %v307_v37 = vmax.f32 %v306_v36, 0.0 }
 0x194   :  { %v309_v38 = vadd.f32 1e-05, %v307_v37 }
 0x196   :  { %444 = vrsqrt.f32 %v309_v38 }
 0x1a0   :  { %v445_v40 = vpop.eup %444 }
 0x1a1   :  { %v311_v41 = vmul.f32 %v445_v40, %v308_v39 }
 0x1a3   :  { %317 = vperm.xlu0 %416, %v311_v41   ;;  %v313_v45 = vmul.f32 %v311_v41, %v303_v29 }
 0x1a5   :  { %v314_v46 = vsub.f32 %v312_v44, %v313_v45 }
 0x1a7   :  { %338 = vperm.xlu1 %417, %v314_v46  }
 0x222   :  { %v318_v47 = vpop.permute.xlu0 %317 }
 0x223   :  { %v320_v48 = vmul.f32 %v318_v47, %v526_v19  ;;  %v321_v51 = vmul.f32 %v318_v47, %v532_v22  ;;  %v322_v52 = vmul.f32 %v318_v47, %v528_v20  ;;  %v323_v55 = vmul.f32 %v318_v47, %v534_v23 }
 0x224   :  { %v324_v56 = vmul.f32 %v318_v47, %v542_v27  ;;  %v325_v57 = vmul.f32 %v318_v47, %v548_v30  ;;  %v326_v60 = vmul.f32 %v318_v47, %v544_v28  ;;  %v327_v61 = vmul.f32 %v318_v47, %v550_v31 }
 0x225   :  { %v328_v62 = vmul.f32 %v318_v47, %v565_v43  ;;  %v329_v63 = vmul.f32 %v318_v47, %v572_v49  ;;  %v330_v19 = vmul.f32 %v318_v47, %v563_v42  ;;  %v331_v22 = vmul.f32 %v318_v47, %v574_v50 }
 0x226   :  { %v332_v20 = vmul.f32 %v318_v47, %v582_v54  ;;  %v333_v23 = vmul.f32 %v318_v47, %v588_v58  ;;  %v334_v27 = vmul.f32 %v318_v47, %v580_v53  ;;  %v335_v30 = vmul.f32 %v318_v47, %v590_v59  ;;  %v339_v0 = vpop.permute.xlu1 %338 }
 0x227   :  { %v341_v28 = vadd.f32 %v339_v0, %v320_v48  ;;  %v342_v1 = vadd.f32 %v339_v0, %v321_v51  ;;  %v343_v31 = vadd.f32 %v339_v0, %v322_v52  ;;  %v344_v2 = vadd.f32 %v339_v0, %v323_v55 }
 0x228   :  { %v345_v43 = vadd.f32 %v339_v0, %v324_v56  ;;  %v346_v3 = vadd.f32 %v339_v0, %v325_v57  ;;  %v347_v49 = vadd.f32 %v339_v0, %v326_v60  ;;  %v348_v4 = vadd.f32 %v339_v0, %v327_v61 }
 0x229   :  { %v349_v42 = vadd.f32 %v339_v0, %v328_v62  ;;  %v350_v5 = vadd.f32 %v339_v0, %v329_v63  ;;  %v351_v50 = vadd.f32 %v339_v0, %v330_v19  ;;  %v352_v6 = vadd.f32 %v339_v0, %v331_v22 }
 0x22a   :  { %v353_v54 = vadd.f32 %v339_v0, %v332_v20  ;;  %v354_v7 = vadd.f32 %v339_v0, %v333_v23  ;;  %v355_v58 = vadd.f32 %v339_v0, %v334_v27  ;;  %v356_v8 = vadd.f32 %v339_v0, %v335_v30 }
 0x22b   :  { %v357_v53 = vmax.f32 %v341_v28, 0.0  ;;  %v358_v9 = vmax.f32 %v342_v1, 0.0  ;;  %v359_v59 = vmax.f32 %v343_v31, 0.0  ;;  %v360_v10 = vmax.f32 %v344_v2, 0.0 }
 0x22c   :  { %v361_v11 = vmax.f32 %v345_v43, 0.0  ;;  %v362_v12 = vmax.f32 %v346_v3, 0.0  ;;  %v363_v13 = vmax.f32 %v347_v49, 0.0  ;;  %v364_v14 = vmax.f32 %v348_v4, 0.0 }
 0x22d   :  { %v365_v15 = vmax.f32 %v349_v42, 0.0  ;;  %v366_v16 = vmax.f32 %v350_v5, 0.0  ;;  %v367_v17 = vmax.f32 %v351_v50, 0.0  ;;  %v368_v18 = vmax.f32 %v352_v6, 0.0  ;;  %373 = vst [vmem:[%s680_s4] sm:$0xff] %v357_v53  ;;  %374 = vst [vmem:[%s680_s4 + $0x8] sm:$0xff] %v358_v9 }
 0x22e   :  { %375 = vst [vmem:[%s680_s4 + $0x10] sm:$0xff] %v359_v59  ;;  %376 = vst [vmem:[%s680_s4 + $0x18] sm:$0xff] %v360_v10  ;;  %v369_v21 = vmax.f32 %v353_v54, 0.0  ;;  %v370_v24 = vmax.f32 %v354_v7, 0.0  ;;  %v371_v25 = vmax.f32 %v355_v58, 0.0  ;;  %v372_v26 = vmax.f32 %v356_v8, 0.0 }
 0x22f   :  { %377 = vst [vmem:[%s680_s4 + $0x20] sm:$0xff] %v361_v11  ;;  %378 = vst [vmem:[%s680_s4 + $0x28] sm:$0xff] %v362_v12 }
 0x230   :  { %379 = vst [vmem:[%s680_s4 + $0x30] sm:$0xff] %v363_v13  ;;  %380 = vst [vmem:[%s680_s4 + $0x38] sm:$0xff] %v364_v14 }
 0x231   :  { %381 = vst [vmem:[%s680_s4 + $0x40] sm:$0xff] %v365_v15  ;;  %382 = vst [vmem:[%s680_s4 + $0x48] sm:$0xff] %v366_v16 }
 0x232   :  { %383 = vst [vmem:[%s680_s4 + $0x50] sm:$0xff] %v367_v17  ;;  %384 = vst [vmem:[%s680_s4 + $0x58] sm:$0xff] %v368_v18 }
 0x233   :  { %385 = vst [vmem:[%s680_s4 + $0x60] sm:$0xff] %v369_v21  ;;  %386 = vst [vmem:[%s680_s4 + $0x68] sm:$0xff] %v370_v24 }
 0x234   :  { %387 = vst [vmem:[%s680_s4 + $0x70] sm:$0xff] %v371_v25  ;;  %388 = vst [vmem:[%s680_s4 + $0x78] sm:$0xff] %v372_v26 }

</bundles_post_ra>
